<compile_context>
chip_gen: v7x
topology: tpu7x:2x2x1
jax: 0.10.0
libtpu: 0.0.40
codegen_flags: <defaults>
</compile_context>

<pallas_src>
import functools
import math

import jax
import jax.numpy as jnp
from jax.experimental import pallas as pl
from jax.experimental.pallas import tpu as pltpu


# ----------------------------------------------------------------------------
# Helpers
# ----------------------------------------------------------------------------
def _round_up(x, m):
    return ((x + m - 1) // m) * m


def _pad2d(a, rows, cols):
    pr, pc = rows - a.shape[0], cols - a.shape[1]
    if pr or pc:
        a = jnp.pad(a, ((0, pr), (0, pc)))
    return a


def _sublane(dtype):
    # dtype-correct sublane multiple: 8 for f32, 16 for bf16, 32 for int8/fp8.
    return max(8, 32 // jnp.dtype(dtype).itemsize)


@functools.lru_cache(maxsize=None)
def _vmem_limit_bytes():
    try:
        cap = int(pltpu.get_tpu_info().vmem_capacity_bytes)
        return int(min(cap * 3 // 4, 64 * 1024 * 1024))
    except Exception:  # pragma: no cover - conservative fallback (v7x-safe)
        return 48 * 1024 * 1024


# Default tile caps: large MXU-friendly tiles, clamped for small shapes.
_TM, _TN, _TK = 256, 512, 1024


# ----------------------------------------------------------------------------
# Fused LoRA kernel.
#   grid = (n_m, n_n, n_k); K is the trailing reduction axis.
#   acc_ref:(tm, tn) f32 accumulates bias + base GEMM.
#   d_ref:(tm, rp)   f32 accumulates the LoRA down projection, computed ONLY
#                    at j == 0 and reused for every other output-column tile.
# ----------------------------------------------------------------------------
def _lora_kernel(x_ref, wb_ref, b_ref, wd_ref, wu_ref, o_ref, acc_ref, d_ref):
    j = pl.program_id(1)
    k = pl.program_id(2)

    @pl.when(k == 0)
    def _():
        # bias folded into the accumulator init -> nothing to add in epilogue.
        acc_ref[...] = jnp.broadcast_to(
            b_ref[...].astype(jnp.float32), acc_ref.shape)

    @pl.when((j == 0) & (k == 0))
    def _():
        d_ref[...] = jnp.zeros_like(d_ref)

    x = x_ref[...]                                    # native dtype on the MXU
    acc_ref[...] += jnp.dot(x, wb_ref[...], preferred_element_type=jnp.float32)

    @pl.when(j == 0)
    def _():
        # down projection depends only on (i, k): compute once, reuse for j>0.
        d_ref[...] += jnp.dot(x, wd_ref[...],
                              preferred_element_type=jnp.float32)

    @pl.when(k == pl.num_programs(2) - 1)
    def _():
        # d is accumulated in f32; single cast to the MXU-native weight dtype
        # (exact for f32 params; one rounding for bf16 params, fine for LoRA).
        up = jnp.dot(d_ref[...].astype(wu_ref.dtype), wu_ref[...],
                     preferred_element_type=jnp.float32)
        o_ref[...] = (acc_ref[...] + up).astype(o_ref.dtype)


# Merged-weight fast path (frozen LoRA / inference): single GEMM + bias.
def _gemm_bias_kernel(x_ref, w_ref, b_ref, o_ref, acc_ref):
    k = pl.program_id(2)

    @pl.when(k == 0)
    def _():
        acc_ref[...] = jnp.broadcast_to(
            b_ref[...].astype(jnp.float32), acc_ref.shape)

    acc_ref[...] += jnp.dot(x_ref[...], w_ref[...],
                            preferred_element_type=jnp.float32)

    @pl.when(k == pl.num_programs(2) - 1)
    def _():
        o_ref[...] = acc_ref[...].astype(o_ref.dtype)


# ----------------------------------------------------------------------------
# One-time weight preparation (hoisted out of the per-call hot path).
# Padding / transpose / scale-fold depend only on (O, K, rank), not on M,
# so the prepared arrays are reusable across calls with any batch size.
# ----------------------------------------------------------------------------
def _norm_tile_caps(tile_caps):
    tm_cap, tn_cap, tk_cap = tile_caps if tile_caps is not None else (_TM, _TN, _TK)
    return int(tm_cap), int(tn_cap), int(tk_cap)


def _as_matrix(w):
    # Accept Conv2d-style (O, C, 1, 1) weights as well as (O, C).
    if w.ndim == 4:
        w = w.reshape(w.shape[0], w.shape[1])
    return w


def _prep_lora(w_base, b_base, w_down, w_up, scale, tile_caps):
    tm_cap, tn_cap, tk_cap = _norm_tile_caps(tile_caps)
    w_base, w_down, w_up = _as_matrix(w_base), _as_matrix(w_down), _as_matrix(w_up)
    O, K = w_base.shape
    r = w_down.shape[0]

    tn = max(128, (min(tn_cap, _round_up(O, 128)) // 128) * 128)
    tk = max(128, (min(tk_cap, _round_up(K, 128)) // 128) * 128)
    rp = _round_up(r, 128)                             # lane-dense LoRA rank dim
    Op, Kp = _round_up(O, tn), _round_up(K, tk)

    wbT = _pad2d(jnp.transpose(w_base), Kp, Op)        # (Kp, Op) pre-transposed
    wdT = _pad2d(jnp.transpose(w_down), Kp, rp)        # (Kp, rp)
    wuT = _pad2d(jnp.transpose(w_up * jnp.asarray(scale, w_up.dtype)), rp, Op)
    bp = jnp.pad(b_base, (0, Op - O)).reshape(1, Op)

    return dict(kind="lora", wbT=wbT, wdT=wdT, wuT=wuT, bp=bp,
                O=O, K=K, tn=tn, tk=tk, rp=rp, Op=Op, Kp=Kp, tm_cap=tm_cap)


def _prep_merged(w_base, b_base, w_down, w_up, scale, tile_caps):
    tm_cap, tn_cap, tk_cap = _norm_tile_caps(tile_caps)
    w_base, w_down, w_up = _as_matrix(w_base), _as_matrix(w_down), _as_matrix(w_up)
    O, K = w_base.shape

    # fold the rank-r update into the base weight ONCE (frozen / inference).
    w_eff = w_base + jnp.asarray(scale, w_base.dtype) * (w_up @ w_down).astype(w_base.dtype)

    tn = max(128, (min(tn_cap, _round_up(O, 128)) // 128) * 128)
    tk = max(128, (min(tk_cap, _round_up(K, 128)) // 128) * 128)
    Op, Kp = _round_up(O, tn), _round_up(K, tk)

    wT = _pad2d(jnp.transpose(w_eff), Kp, Op)
    bp = jnp.pad(b_base, (0, Op - O)).reshape(1, Op)
    return dict(kind="merged", wT=wT, bp=bp,
                O=O, K=K, tn=tn, tk=tk, Op=Op, Kp=Kp, tm_cap=tm_cap)


def prepare_lora_linear(params, rank, alpha=1.0, merge_weights=False, tile_caps=None):
    scale = alpha / rank
    args = (params["w_base"], params["b_base"], params["w_down"], params["w_up"])
    if merge_weights:
        return _prep_merged(*args, scale, tile_caps)
    return _prep_lora(*args, scale, tile_caps)


prepare_lora_conv1x1 = prepare_lora_linear   # identical matrices for 1x1 convs


# ----------------------------------------------------------------------------
# pallas_call runners
# ----------------------------------------------------------------------------
def _row_tile(M, dtype, tm_cap):
    sub = _sublane(dtype)
    tm = min(tm_cap, _round_up(M, sub))
    tm = max(sub, (tm // sub) * sub)
    return tm, _round_up(M, tm)


def _run_lora(x2d, p):
    M = x2d.shape[0]
    dt = x2d.dtype
    tn, tk, rp, Op, Kp = p["tn"], p["tk"], p["rp"], p["Op"], p["Kp"]
    tm, Mp = _row_tile(M, dt, p["tm_cap"])
    xp = _pad2d(x2d, Mp, Kp)

    n_m, n_n, n_k = Mp // tm, Op // tn, Kp // tk

    flops = 2 * Mp * (Kp * Op + Kp * rp + rp * Op)
    bytes_accessed = int(
        xp.size * xp.dtype.itemsize
        + n_m * p["wbT"].size * p["wbT"].dtype.itemsize        # wb streamed per row tile
        + n_m * p["wdT"].size * p["wdT"].dtype.itemsize        # wd streamed once per row tile
        + p["wuT"].size * p["wuT"].dtype.itemsize
        + p["bp"].size * p["bp"].dtype.itemsize
        + Mp * Op * jnp.dtype(dt).itemsize)

    out = pl.pallas_call(
        _lora_kernel,
        out_shape=jax.ShapeDtypeStruct((Mp, Op), dt),
        grid_spec=pltpu.PrefetchScalarGridSpec(
            num_scalar_prefetch=0,
            grid=(n_m, n_n, n_k),
            in_specs=[
                pl.BlockSpec((tm, tk), lambda i, j, k: (i, k)),    # x row tile
                pl.BlockSpec((tk, tn), lambda i, j, k: (k, j)),    # base weight^T
                pl.BlockSpec((1, tn), lambda i, j, k: (0, j)),     # bias row
                # LoRA down^T: only needed while j == 0; for j > 0 the block
                # index collapses to (0, 0) so it is not re-streamed from HBM.
                pl.BlockSpec((tk, rp),
                             lambda i, j, k: (jnp.where(j == 0, k, 0), 0)),
                pl.BlockSpec((rp, tn), lambda i, j, k: (0, j)),    # LoRA up^T (scaled)
            ],
            out_specs=pl.BlockSpec((tm, tn), lambda i, j, k: (i, j)),
            scratch_shapes=[pltpu.VMEM((tm, tn), jnp.float32),
                            pltpu.VMEM((tm, rp), jnp.float32)],
        ),
        compiler_params=pltpu.CompilerParams(
            # Only the M axis is megacore-sharded: the persistent d_ref scratch
            # must see j in order on one core for the j==0 reuse to be valid.
            dimension_semantics=("parallel", "arbitrary", "arbitrary"),
            vmem_limit_bytes=_vmem_limit_bytes()),
        cost_estimate=pl.CostEstimate(flops=flops, transcendentals=0,
                                      bytes_accessed=bytes_accessed),
    )(xp, p["wbT"], p["bp"], p["wdT"], p["wuT"])
    return out[:M, :p["O"]]


def _run_gemm_bias(x2d, p):
    M = x2d.shape[0]
    dt = x2d.dtype
    tn, tk, Op, Kp = p["tn"], p["tk"], p["Op"], p["Kp"]
    tm, Mp = _row_tile(M, dt, p["tm_cap"])
    xp = _pad2d(x2d, Mp, Kp)

    n_m, n_n, n_k = Mp // tm, Op // tn, Kp // tk

    flops = 2 * Mp * Kp * Op
    bytes_accessed = int(xp.size * xp.dtype.itemsize
                         + n_m * p["wT"].size * p["wT"].dtype.itemsize
                         + p["bp"].size * p["bp"].dtype.itemsize
                         + Mp * Op * jnp.dtype(dt).itemsize)

    out = pl.pallas_call(
        _gemm_bias_kernel,
        out_shape=jax.ShapeDtypeStruct((Mp, Op), dt),
        grid_spec=pltpu.PrefetchScalarGridSpec(
            num_scalar_prefetch=0,
            grid=(n_m, n_n, n_k),
            in_specs=[
                pl.BlockSpec((tm, tk), lambda i, j, k: (i, k)),
                pl.BlockSpec((tk, tn), lambda i, j, k: (k, j)),
                pl.BlockSpec((1, tn), lambda i, j, k: (0, j)),
            ],
            out_specs=pl.BlockSpec((tm, tn), lambda i, j, k: (i, j)),
            scratch_shapes=[pltpu.VMEM((tm, tn), jnp.float32)],
        ),
        compiler_params=pltpu.CompilerParams(
            dimension_semantics=("parallel", "parallel", "arbitrary"),
            vmem_limit_bytes=_vmem_limit_bytes()),
        cost_estimate=pl.CostEstimate(flops=flops, transcendentals=0,
                                      bytes_accessed=bytes_accessed),
    )(xp, p["wT"], p["bp"])
    return out[:M, :p["O"]]


def _apply_prepared_2d(x2d, prep):
    if prep["kind"] == "merged":
        return _run_gemm_bias(x2d, prep)
    return _run_lora(x2d, prep)


# ----------------------------------------------------------------------------
# Public wrappers matching the two supported base layers
# ----------------------------------------------------------------------------
def lora_linear(x, params, rank, alpha=1.0, merge_weights=False, prepared=None):
    """x: (..., in_features). Returns (..., out_features).

    Pass `prepared=prepare_lora_linear(...)` to reuse cached padded/transposed
    weights across calls (recommended; avoids per-call transpose/pad traffic).
    """
    if prepared is None:
        prepared = prepare_lora_linear(params, rank, alpha, merge_weights)
    lead = x.shape[:-1]
    x2d = x.reshape(-1, x.shape[-1])
    y2d = _apply_prepared_2d(x2d, prepared)
    return y2d.reshape(*lead, prepared["O"])


def lora_conv1x1(x_nchw, params, rank, alpha=1.0, merge_weights=False, prepared=None):
    """x_nchw: (N, C_in, H, W) -> (N, C_out, H, W). Base conv is 1x1/stride 1."""
    if prepared is None:
        prepared = prepare_lora_conv1x1(params, rank, alpha, merge_weights)
    N, C, H, W = x_nchw.shape
    # layout: NCHW -> NHWC -> (N*H*W, C_in) rows; 1x1 conv == per-pixel matmul.
    x2d = jnp.transpose(x_nchw, (0, 2, 3, 1)).reshape(-1, C)
    y2d = _apply_prepared_2d(x2d, prepared)
    O = prepared["O"]
    return jnp.transpose(y2d.reshape(N, H, W, O), (0, 3, 1, 2))


# ----------------------------------------------------------------------------
# Deterministic parameter construction (mirrors LoRA.__init__ shapes / init)
# ----------------------------------------------------------------------------
def make_lora_params(key, in_dim, out_dim, rank, dtype=jnp.float32):
    k1, k2, k3 = jax.random.split(key, 3)
    bound_base = 1.0 / math.sqrt(in_dim)
    w_base = jax.random.uniform(k1, (out_dim, in_dim), dtype,
                                minval=-bound_base, maxval=bound_base)
    b_base = jax.random.uniform(k2, (out_dim,), dtype,
                                minval=-bound_base, maxval=bound_base)
    # kaiming_uniform_(a=sqrt(5)) on (rank, in_dim): bound = 1/sqrt(fan_in)
    bound_down = 1.0 / math.sqrt(in_dim)
    w_down = jax.random.uniform(k3, (rank, in_dim), dtype,
                                minval=-bound_down, maxval=bound_down)
    w_up = jnp.zeros((out_dim, rank), dtype)   # nn.init.zeros_
    return dict(w_base=w_base, b_base=b_base, w_down=w_down, w_up=w_up)


def _reference(x2d, p, scale):
    base = x2d @ p["w_base"].T + p["b_base"]
    delta = (x2d @ p["w_down"].T) @ p["w_up"].T
    return base + delta * scale


if __name__ == "__main__":
    key = jax.random.PRNGKey(0)
    k1, k2, k3, k4, k5, k6, k7, k8 = jax.random.split(key, 8)
    checks = []

    # ---- 1) Linear base layer: batch=2, seq=8, in=32, out=48, rank=4 ----
    B, S, IN, OUT, R = 2, 8, 32, 48, 4
    alpha = 2.0
    x_lin = jax.random.normal(k1, (B, S, IN), jnp.float32)
    p_lin = make_lora_params(k2, IN, OUT, R)
    # give the (normally zero-init) up-projection nonzero values too, so the
    # low-rank path is actually exercised numerically.
    p_lin_nz = dict(p_lin)
    p_lin_nz["w_up"] = 0.02 * jax.random.normal(k3, (OUT, R), jnp.float32)

    prep_nz = prepare_lora_linear(p_lin_nz, R, alpha)                    # cached once
    prep_mg = prepare_lora_linear(p_lin_nz, R, alpha, merge_weights=True)

    y_lin = lora_linear(x_lin, p_lin, R, alpha)                          # convenience path
    y_lin_nz = lora_linear(x_lin, p_lin_nz, R, alpha, prepared=prep_nz)  # cached-weights path
    y_lin_mg = lora_linear(x_lin, p_lin_nz, R, alpha, merge_weights=True,
                           prepared=prep_mg)
    jax.block_until_ready((y_lin, y_lin_nz, y_lin_mg))

    ref_lin = _reference(x_lin.reshape(-1, IN), p_lin, alpha / R).reshape(B, S, OUT)
    ref_lin_nz = _reference(x_lin.reshape(-1, IN), p_lin_nz, alpha / R).reshape(B, S, OUT)
    checks += [jnp.allclose(y_lin, ref_lin, atol=1e-5, rtol=1e-5),
               jnp.allclose(y_lin_nz, ref_lin_nz, atol=1e-5, rtol=1e-5),
               jnp.allclose(y_lin_mg, ref_lin_nz, atol=1e-5, rtol=1e-5)]

    # ---- 2) Conv2d (1x1) base layer: x = (2, 4, 16, 16), out_ch=8, rank=2 ----
    N, C, H, W, OC, RC = 2, 4, 16, 16, 8, 2
    x_conv = jax.random.normal(k4, (N, C, H, W), jnp.float32)
    p_conv = make_lora_params(k5, C, OC, RC)
    y_conv = jax.block_until_ready(lora_conv1x1(x_conv, p_conv, RC, alpha=1.0))
    x_c2d = jnp.transpose(x_conv, (0, 2, 3, 1)).reshape(-1, C)
    ref_conv = jnp.transpose(
        _reference(x_c2d, p_conv, 1.0 / RC).reshape(N, H, W, OC), (0, 3, 1, 2))
    checks.append(jnp.allclose(y_conv, ref_conv, atol=1e-5, rtol=1e-5))

    # ---- 3) Multi-tile check: small tile caps force n_m, n_n, n_k > 1 so the
    #          down-projection reuse across output-column tiles is exercised.
    B3, S3, IN3, OUT3, R3 = 2, 24, 256, 256, 4
    x_mt = jax.random.normal(k6, (B3, S3, IN3), jnp.float32)
    p_mt = make_lora_params(k7, IN3, OUT3, R3)
    p_mt["w_up"] = 0.05 * jax.random.normal(k8, (OUT3, R3), jnp.float32)
    prep_mt = prepare_lora_linear(p_mt, R3, alpha=1.5, tile_caps=(16, 128, 128))
    y_mt = jax.block_until_ready(
        lora_linear(x_mt, p_mt, R3, alpha=1.5, prepared=prep_mt))
    ref_mt = _reference(x_mt.reshape(-1, IN3), p_mt, 1.5 / R3).reshape(B3, S3, OUT3)
    checks.append(jnp.allclose(y_mt, ref_mt, atol=1e-4, rtol=1e-4))

    if all(bool(c) for c in checks):
        print("KERNEL_OK")
    else:
        print("MISMATCH", [bool(c) for c in checks])
</pallas_src>

<mosaic_0001>
module attributes {stable_mosaic.version = 11 : i64} {
  func.func @_lora_kernel(%arg0: i32, %arg1: i32, %arg2: i32, %arg3: memref<16x128xf32, #tpu.memory_space<vmem>>, %arg4: memref<128x128xf32, #tpu.memory_space<vmem>>, %arg5: memref<1x128xf32, #tpu.memory_space<vmem>>, %arg6: memref<128x128xf32, #tpu.memory_space<vmem>>, %arg7: memref<128x128xf32, #tpu.memory_space<vmem>>, %arg8: memref<16x128xf32, #tpu.memory_space<vmem>>, %arg9: memref<16x128xf32, #tpu.memory_space<vmem>>, %arg10: memref<16x128xf32, #tpu.memory_space<vmem>>) attributes {dimension_semantics = [#tpu.dimension_semantics<parallel>, #tpu.dimension_semantics<arbitrary>, #tpu.dimension_semantics<arbitrary>], iteration_bounds = array<i64: 1, 1, 1>, scalar_prefetch = 0 : i64, scratch_operands = 2 : i64, tpu.core_type = #tpu.core_type<tc>, window_params = [{transform_indices = @transform_0, window_bounds = array<i64: 16, 128>}, {transform_indices = @transform_1, window_bounds = array<i64: 128, 128>}, {transform_indices = @transform_2, window_bounds = array<i64: 1, 128>}, {transform_indices = @transform_3, window_bounds = array<i64: 128, 128>}, {transform_indices = @transform_4, window_bounds = array<i64: 128, 128>}, {transform_indices = @transform_5, window_bounds = array<i64: 16, 128>}]} {
    %c0_i32 = arith.constant 0 : i32
    %0 = arith.cmpi eq, %arg2, %c0_i32 : i32
    %1 = arith.extui %0 : i1 to i32
    %c0_i32_0 = arith.constant 0 : i32
    %2 = arith.cmpi ne, %1, %c0_i32_0 : i32
    scf.if %2 {
      %c0_15 = arith.constant 0 : index
      %c0_16 = arith.constant 0 : index
      %20 = vector.load %arg5[%c0_15, %c0_16] : memref<1x128xf32, #tpu.memory_space<vmem>>, vector<1x128xf32>
      %21 = vector.shape_cast %20 : vector<1x128xf32> to vector<1x128xf32>
      %22 = vector.broadcast %21 : vector<1x128xf32> to vector<16x128xf32>
      %c0_17 = arith.constant 0 : index
      %c0_18 = arith.constant 0 : index
      %23 = vector.load %arg9[%c0_17, %c0_18] : memref<16x128xf32, #tpu.memory_space<vmem>>, vector<16x128xf32>
      tpu.vector_store %arg9[%c0_17, %c0_18], %22 {strides = array<i32>} : memref<16x128xf32, #tpu.memory_space<vmem>>, vector<16x128xf32>,
    } else {
    }
    %c0_i32_1 = arith.constant 0 : i32
    %3 = arith.cmpi eq, %arg1, %c0_i32_1 : i32
    %c0_i32_2 = arith.constant 0 : i32
    %4 = arith.cmpi eq, %arg2, %c0_i32_2 : i32
    %5 = arith.andi %3, %4 : i1
    %6 = arith.extui %5 : i1 to i32
    %c0_i32_3 = arith.constant 0 : i32
    %7 = arith.cmpi ne, %6, %c0_i32_3 : i32
    scf.if %7 {
      %cst_15 = arith.constant 0.000000e+00 : f32
      %20 = vector.broadcast %cst_15 : f32 to vector<16x128xf32>
      %c0_16 = arith.constant 0 : index
      %c0_17 = arith.constant 0 : index
      %21 = vector.load %arg10[%c0_16, %c0_17] : memref<16x128xf32, #tpu.memory_space<vmem>>, vector<16x128xf32>
      tpu.vector_store %arg10[%c0_16, %c0_17], %20 {strides = array<i32>} : memref<16x128xf32, #tpu.memory_space<vmem>>, vector<16x128xf32>,
    } else {
    }
    %c0 = arith.constant 0 : index
    %c0_4 = arith.constant 0 : index
    %8 = vector.load %arg3[%c0, %c0_4] : memref<16x128xf32, #tpu.memory_space<vmem>>, vector<16x128xf32>
    %c0_5 = arith.constant 0 : index
    %c0_6 = arith.constant 0 : index
    %9 = vector.load %arg9[%c0_5, %c0_6] : memref<16x128xf32, #tpu.memory_space<vmem>>, vector<16x128xf32>
    %c0_7 = arith.constant 0 : index
    %c0_8 = arith.constant 0 : index
    %10 = vector.load %arg4[%c0_7, %c0_8] : memref<128x128xf32, #tpu.memory_space<vmem>>, vector<128x128xf32>
    %cst = arith.constant dense<0.000000e+00> : vector<16x128xf32>
    %11 = tpu.matmul %8, %10, %cst {dimension_numbers = #tpu.dot_dimension_numbers<[1], [0], [0], [1], [0, 0, 1, 1], [], []>} : vector<16x128xf32>, vector<128x128xf32>, vector<16x128xf32> -> vector<16x128xf32>
    %12 = arith.addf %9, %11 : vector<16x128xf32>
    %c0_9 = arith.constant 0 : index
    %c0_10 = arith.constant 0 : index
    %13 = vector.load %arg9[%c0_9, %c0_10] : memref<16x128xf32, #tpu.memory_space<vmem>>, vector<16x128xf32>
    tpu.vector_store %arg9[%c0_9, %c0_10], %12 {strides = array<i32>} : memref<16x128xf32, #tpu.memory_space<vmem>>, vector<16x128xf32>,
    %c0_i32_11 = arith.constant 0 : i32
    %14 = arith.cmpi eq, %arg1, %c0_i32_11 : i32
    %15 = arith.extui %14 : i1 to i32
    %c0_i32_12 = arith.constant 0 : i32
    %16 = arith.cmpi ne, %15, %c0_i32_12 : i32
    scf.if %16 {
      %c0_15 = arith.constant 0 : index
      %c0_16 = arith.constant 0 : index
      %20 = vector.load %arg10[%c0_15, %c0_16] : memref<16x128xf32, #tpu.memory_space<vmem>>, vector<16x128xf32>
      %c0_17 = arith.constant 0 : index
      %c0_18 = arith.constant 0 : index
      %21 = vector.load %arg6[%c0_17, %c0_18] : memref<128x128xf32, #tpu.memory_space<vmem>>, vector<128x128xf32>
      %cst_19 = arith.constant dense<0.000000e+00> : vector<16x128xf32>
      %22 = tpu.matmul %8, %21, %cst_19 {dimension_numbers = #tpu.dot_dimension_numbers<[1], [0], [0], [1], [0, 0, 1, 1], [], []>} : vector<16x128xf32>, vector<128x128xf32>, vector<16x128xf32> -> vector<16x128xf32>
      %23 = arith.addf %20, %22 : vector<16x128xf32>
      %c0_20 = arith.constant 0 : index
      %c0_21 = arith.constant 0 : index
      %24 = vector.load %arg10[%c0_20, %c0_21] : memref<16x128xf32, #tpu.memory_space<vmem>>, vector<16x128xf32>
      tpu.vector_store %arg10[%c0_20, %c0_21], %23 {strides = array<i32>} : memref<16x128xf32, #tpu.memory_space<vmem>>, vector<16x128xf32>,
    } else {
    }
    %c0_i32_13 = arith.constant 0 : i32
    %17 = arith.cmpi eq, %arg2, %c0_i32_13 : i32
    %18 = arith.extui %17 : i1 to i32
    %c0_i32_14 = arith.constant 0 : i32
    %19 = arith.cmpi ne, %18, %c0_i32_14 : i32
    scf.if %19 {
      %c0_15 = arith.constant 0 : index
      %c0_16 = arith.constant 0 : index
      %20 = vector.load %arg10[%c0_15, %c0_16] : memref<16x128xf32, #tpu.memory_space<vmem>>, vector<16x128xf32>
      %c0_17 = arith.constant 0 : index
      %c0_18 = arith.constant 0 : index
      %21 = vector.load %arg7[%c0_17, %c0_18] : memref<128x128xf32, #tpu.memory_space<vmem>>, vector<128x128xf32>
      %cst_19 = arith.constant dense<0.000000e+00> : vector<16x128xf32>
      %22 = tpu.matmul %20, %21, %cst_19 {dimension_numbers = #tpu.dot_dimension_numbers<[1], [0], [0], [1], [0, 0, 1, 1], [], []>} : vector<16x128xf32>, vector<128x128xf32>, vector<16x128xf32> -> vector<16x128xf32>
      %c0_20 = arith.constant 0 : index
      %c0_21 = arith.constant 0 : index
      %23 = vector.load %arg9[%c0_20, %c0_21] : memref<16x128xf32, #tpu.memory_space<vmem>>, vector<16x128xf32>
      %24 = arith.addf %23, %22 : vector<16x128xf32>
      %c0_22 = arith.constant 0 : index
      %c0_23 = arith.constant 0 : index
      %25 = vector.load %arg8[%c0_22, %c0_23] : memref<16x128xf32, #tpu.memory_space<vmem>>, vector<16x128xf32>
      tpu.vector_store %arg8[%c0_22, %c0_23], %24 {strides = array<i32>} : memref<16x128xf32, #tpu.memory_space<vmem>>, vector<16x128xf32>,
    } else {
    }
    return
  }
  func.func @transform_0(%arg0: i32, %arg1: i32, %arg2: i32) -> (i32, i32) {
    %c0_i32 = arith.constant 0 : i32
    return %arg0, %arg2 : i32, i32
  }
  func.func @transform_1(%arg0: i32, %arg1: i32, %arg2: i32) -> (i32, i32) {
    %c0_i32 = arith.constant 0 : i32
    return %arg2, %arg1 : i32, i32
  }
  func.func @transform_2(%arg0: i32, %arg1: i32, %arg2: i32) -> (i32, i32) {
    %c0_i32 = arith.constant 0 : i32
    %c0_i32_0 = arith.constant 0 : i32
    return %c0_i32, %arg1 : i32, i32
  }
  func.func @transform_3(%arg0: i32, %arg1: i32, %arg2: i32) -> (i32, i32) {
    %c0_i32 = arith.constant 0 : i32
    %0 = arith.cmpi eq, %arg1, %c0_i32 : i32
    %c0_i32_0 = arith.constant 0 : i32
    %1 = arith.select %0, %arg2, %c0_i32_0 : i32
    %c0_i32_1 = arith.constant 0 : i32
    %c0_i32_2 = arith.constant 0 : i32
    return %1, %c0_i32_1 : i32, i32
  }
  func.func @transform_4(%arg0: i32, %arg1: i32, %arg2: i32) -> (i32, i32) {
    %c0_i32 = arith.constant 0 : i32
    %c0_i32_0 = arith.constant 0 : i32
    return %c0_i32, %arg1 : i32, i32
  }
  func.func @transform_5(%arg0: i32, %arg1: i32, %arg2: i32) -> (i32, i32) {
    %c0_i32 = arith.constant 0 : i32
    return %arg0, %arg1 : i32, i32
  }
}

</mosaic_0001>

<bundles_post_ra>
// kernel: tpu_custom_call.1
= control target key start
LH: loop header
LB: loop body
LE: loop exit
PB: predicated region body
PF: predicated region fallthrough
CT: control target
= control target key end

     0   :  { %10 = vsyncpa [#allocation5], 0  ;;  %s940_s0 = inlined_call_operand.hbm [shape: f32[16,128], index: 0, kind: input, shape index: {}]   ;;  %s941_s1 = inlined_call_operand.hbm [shape: f32[128,128], index: 1, kind: input, shape index: {}]   ;;  %s942_s2 = inlined_call_operand.vmem [shape: f32[1,128], index: 2, kind: input, shape index: {}]   ;;  %s943_s3 = inlined_call_operand.hbm [shape: f32[128,128], index: 3, kind: input, shape index: {}]   ;;  %s944_s4 = inlined_call_operand.hbm [shape: f32[128,128], index: 4, kind: input, shape index: {}]   ;;  %s945_s5 = inlined_call_operand.hbm [shape: f32[16,128], index: 5, kind: output, shape index: {}]  }
   0x1   :  { %11 = vsyncpa [#allocation8], 0 }
   0x2   :  { %12 = vsyncpa [#allocation11], 0 }
   0x3   :  { %13 = vsyncpa [#allocation6], 0  ;;  %s811_s18 = smov [#allocation7]   ;;  %s812_s20 = smov [#allocation4]  }
   0x4   :  { %s31_s19 = sshll.u32 %s811_s18, 4  ;;  %s19_s21 = sshll.u32 %s812_s20, 4  ;;  %s32_s19 = int_to_ptr.vmem [resolvable:$true] %s31_s19  ;;  %s848_s21 = int_to_ptr.vmem [resolvable:$true] %s19_s21 }
   0x5   :  { %s693_s24 = scalar_lea.hbm %s941_s1, 2048 }
   0x6   :  { %p694_p0 = scmp.ne.s32.totalorder %s941_s1, %s693_s24  ;;  %p697_p1 = scmp.lt.u32.totalorder %s693_s24, %s941_s1 }
   0x8   :  { %p699_p2 = pnand %p697_p1, %p694_p0 }
   0xa   :  { %702 = shalt.err (!%p699_p2)
}
   0xb   :  { %s703_s29 = scalar_lea.vmem %s32_s19, 2048  ;;  %p708_p4 = scmp.lt.s32.totalorder %s32_s19, %s32_s19 }
   0xc   :  { %p704_p3 = scmp.ne.s32.totalorder %s32_s19, %s703_s29  ;;  %p709_p5 = scmp.lt.s32.totalorder %s703_s29, %s703_s29 }
   0xe   :  { %p710_p6 = por %p709_p5, %p708_p4 }
  0x10   :  { %p711_p7 = pnand %p710_p6, %p704_p3 }
  0x12   :  { %714 = shalt.err (!%p711_p7)
}
  0x13   :  { %s813_s30 = smov 128   ;;  %s814_s6 = smov 8  }
  0x14   :  { %37 = dma.hbm_to_vmem [thread:$0]  %s941_s1, 2048, %s32_s19, [#allocation8], %s813_s30, %s813_s30, %s814_s6  }
  0x15   :  { %s715_s11 = scalar_lea.hbm %s940_s0, 256 }
  0x16   :  { %p716_p8 = scmp.ne.s32.totalorder %s940_s0, %s715_s11  ;;  %p719_p9 = scmp.lt.u32.totalorder %s715_s11, %s940_s0 }
  0x18   :  { %p721_p10 = pnand %p719_p9, %p716_p8 }
  0x1a   :  { %724 = shalt.err (!%p721_p10)
}
  0x1b   :  { %s725_s16 = scalar_lea.vmem %s848_s21, 256  ;;  %p730_p12 = scmp.lt.s32.totalorder %s848_s21, %s848_s21 }
  0x1c   :  { %p726_p11 = scmp.ne.s32.totalorder %s848_s21, %s725_s16  ;;  %p731_p13 = scmp.lt.s32.totalorder %s725_s16, %s725_s16 }
  0x1e   :  { %p732_p0 = por %p731_p13, %p730_p12 }
  0x20   :  { %p733_p1 = pnand %p732_p0, %p726_p11 }
  0x22   :  { %736 = shalt.err (!%p733_p1)
}
  0x23   :  { %25 = dma.hbm_to_vmem [thread:$0]  %s940_s0, 256, %s848_s21, [#allocation5], %s813_s30, %s813_s30, %s814_s6  }
  0x24   :  { %s815_s18 = smov [#allocation9]   ;;  %s816_s20 = smov [#allocation10]  }
  0x25   :  { %s50_s19 = sshll.u32 %s815_s18, 4  ;;  %s62_s22 = sshll.u32 %s816_s20, 4  ;;  %s51_s19 = int_to_ptr.vmem [resolvable:$true] %s50_s19  ;;  %s885_s22 = int_to_ptr.vmem [resolvable:$true] %s62_s22 }
  0x26   :  { %s737_s25 = scalar_lea.hbm %s943_s3, 2048 }
  0x27   :  { %p738_p2 = scmp.ne.s32.totalorder %s943_s3, %s737_s25  ;;  %p741_p3 = scmp.lt.u32.totalorder %s737_s25, %s943_s3 }
  0x29   :  { %p743_p4 = pnand %p741_p3, %p738_p2 }
  0x2b   :  { %746 = shalt.err (!%p743_p4)
}
  0x2c   :  { %s747_s0 = scalar_lea.vmem %s51_s19, 2048  ;;  %p752_p6 = scmp.lt.s32.totalorder %s51_s19, %s51_s19 }
  0x2d   :  { %p748_p5 = scmp.ne.s32.totalorder %s51_s19, %s747_s0  ;;  %p753_p7 = scmp.lt.s32.totalorder %s747_s0, %s747_s0 }
  0x2f   :  { %p754_p8 = por %p753_p7, %p752_p6 }
  0x31   :  { %p755_p9 = pnand %p754_p8, %p748_p5 }
  0x33   :  { %758 = shalt.err (!%p755_p9)
}
  0x34   :  { %56 = dma.hbm_to_vmem [thread:$0]  %s943_s3, 2048, %s51_s19, [#allocation8], %s813_s30, %s813_s30, %s814_s6  }
  0x35   :  { %s759_s10 = scalar_lea.hbm %s944_s4, 2048 }
  0x36   :  { %p760_p10 = scmp.ne.s32.totalorder %s944_s4, %s759_s10  ;;  %p763_p11 = scmp.lt.u32.totalorder %s759_s10, %s944_s4 }
  0x38   :  { %p765_p12 = pnand %p763_p11, %p760_p10 }
  0x3a   :  { %768 = shalt.err (!%p765_p12)
}
  0x3b   :  { %s769_s15 = scalar_lea.vmem %s885_s22, 2048  ;;  %p774_p0 = scmp.lt.s32.totalorder %s885_s22, %s885_s22 }
  0x3c   :  { %p770_p13 = scmp.ne.s32.totalorder %s885_s22, %s769_s15  ;;  %p775_p1 = scmp.lt.s32.totalorder %s769_s15, %s769_s15 }
  0x3e   :  { %p776_p2 = por %p775_p1, %p774_p0 }
  0x40   :  { %p777_p3 = pnand %p776_p2, %p770_p13 }
  0x42   :  { %780 = shalt.err (!%p777_p3)
}
  0x43   :  { %68 = dma.hbm_to_vmem [thread:$0]  %s944_s4, 2048, %s885_s22, [#allocation11], %s813_s30, %s813_s30, %s814_s6  }
  0x44   :  { %803 = dma.done.wait [#allocation5], 256  }
  0x45   :  { %804 = vsyncadd [#allocation5], 4294967040 }
  0x46   :  { %805 = dma.done.wait [#allocation8], 4096  }
  0x47   :  { %806 = vsyncadd [#allocation8], 4294963200 }
  0x48   :  { %807 = dma.done.wait [#allocation11], 2048  }
  0x49   :  { %808 = vsyncadd [#allocation11], 4294965248  ;;  %v208_v0 = vld [vmem:[#allocation9] sm:$0xff]  ;;  %v209_v1 = vld [vmem:[#allocation9 + $0x8] sm:$0xff]  ;;  %s817_s17 = smov [#allocation12]  }
  0x4a   :  { %v210_v2 = vld [vmem:[#allocation9 + $0x10] sm:$0xff]  ;;  %v618_v3 = vpack.c.bf16 %v209_v1, %v208_v0  ;;  %v211_v4 = vld [vmem:[#allocation9 + $0x18] sm:$0xff]  ;;  %v212_v6 = vld [vmem:[#allocation9 + $0x20] sm:$0xff]  ;;  %s410_s18 = sshll.u32 %s817_s17, 4  ;;  %s411_s18 = int_to_ptr.vmem [resolvable:$true] %s410_s18 }
  0x4b   :  { %v622_v5 = vpack.c.bf16 %v211_v4, %v210_v2  ;;  %v213_v7 = vld [vmem:[#allocation9 + $0x28] sm:$0xff]  ;;  %v214_v9 = vld [vmem:[#allocation9 + $0x30] sm:$0xff]  ;;  %v215_v10 = vld [vmem:[#allocation9 + $0x38] sm:$0xff]  ;;  %s781_s19 = scalar_lea.vmem %s411_s18, 256  ;;  %p786_p5 = scmp.lt.s32.totalorder %s411_s18, %s411_s18 }
  0x4c   :  { %619 = vmatprep.subr.bf16.mxu1 %v618_v3  ;;  %v626_v8 = vpack.c.bf16 %v213_v7, %v212_v6  ;;  %v104_v11 = vld [vmem:[#allocation4] sm:$0xff]  ;;  %v108_v12 = vld [vmem:[#allocation7] sm:$0xff]  ;;  %v109_v13 = vld [vmem:[#allocation7 + $0x8] sm:$0xff]  ;;  %v630_v20 = vpack.c.bf16 %v215_v10, %v214_v9  ;;  %p782_p4 = scmp.ne.s32.totalorder %s411_s18, %s781_s19  ;;  %p787_p6 = scmp.lt.s32.totalorder %s781_s19, %s781_s19 }
  0x4d   :  { %621 = vmatpush3.bf16.msra.mxu1 %v618_v3  ;;  %548 = vmatprep.mubr.f32.mxu1 %v104_v11  ;;  %v110_v14 = vld [vmem:[#allocation7 + $0x10] sm:$0xff]  ;;  %v586_v15 = vpack.c.bf16 %v109_v13, %v108_v12  ;;  %v111_v16 = vld [vmem:[#allocation7 + $0x18] sm:$0xff]  ;;  %v112_v18 = vld [vmem:[#allocation7 + $0x20] sm:$0xff] }
  0x4e   :  { %623 = vmatprep.subr.bf16.mxu1 %v622_v5  ;;  %513 = vmatprep.mubr.f32.mxu0 %v104_v11  ;;  %v590_v17 = vpack.c.bf16 %v111_v16, %v110_v14  ;;  %v113_v19 = vld [vmem:[#allocation7 + $0x28] sm:$0xff]  ;;  %v216_v21 = vld [vmem:[#allocation9 + $0x40] sm:$0xff]  ;;  %v114_v24 = vld [vmem:[#allocation7 + $0x30] sm:$0xff]  ;;  %p788_p7 = por %p787_p6, %p786_p5 }
  0x4f   :  { %587 = vmatprep.subr.bf16.mxu0 %v586_v15  ;;  %v217_v22 = vld [vmem:[#allocation9 + $0x48] sm:$0xff]  ;;  %v594_v23 = vpack.c.bf16 %v113_v19, %v112_v18  ;;  %v115_v25 = vld [vmem:[#allocation7 + $0x38] sm:$0xff]  ;;  %v218_v27 = vld [vmem:[#allocation9 + $0x50] sm:$0xff] }
  0x50   :  { %589 = vmatpush3.bf16.msra.mxu0 %v586_v15  ;;  %v634_v26 = vpack.c.bf16 %v217_v22, %v216_v21  ;;  %v219_v28 = vld [vmem:[#allocation9 + $0x58] sm:$0xff]  ;;  %v598_v29 = vpack.c.bf16 %v115_v25, %v114_v24  ;;  %v116_v30 = vld [vmem:[#allocation7 + $0x40] sm:$0xff]  ;;  %v117_v31 = vld [vmem:[#allocation7 + $0x48] sm:$0xff]  ;;  %p789_p8 = pnand %p788_p7, %p782_p4 }
  0x51   :  { %625 = vmatpush3.bf16.msra.mxu1 %v622_v5  ;;  %591 = vmatprep.subr.bf16.mxu0 %v590_v17  ;;  %v638_v32 = vpack.c.bf16 %v219_v28, %v218_v27  ;;  %v220_v33 = vld [vmem:[#allocation9 + $0x60] sm:$0xff]  ;;  %v221_v34 = vld [vmem:[#allocation9 + $0x68] sm:$0xff]  ;;  %v602_v35 = vpack.c.bf16 %v117_v31, %v116_v30  ;;  %v118_v36 = vld [vmem:[#allocation7 + $0x50] sm:$0xff] }
  0x52   :  { %627 = vmatprep.subr.bf16.mxu1 %v626_v8  ;;  %v119_v37 = vld [vmem:[#allocation7 + $0x58] sm:$0xff]  ;;  %v642_v38 = vpack.c.bf16 %v221_v34, %v220_v33  ;;  %v222_v39 = vld [vmem:[#allocation9 + $0x70] sm:$0xff]  ;;  %v120_v42 = vld [vmem:[#allocation7 + $0x60] sm:$0xff] }
  0x53   :  { %v223_v40 = vld [vmem:[#allocation9 + $0x78] sm:$0xff]  ;;  %v606_v41 = vpack.c.bf16 %v119_v37, %v118_v36  ;;  %v121_v43 = vld [vmem:[#allocation7 + $0x68] sm:$0xff]  ;;  %v122_v46 = vld [vmem:[#allocation7 + $0x70] sm:$0xff] }
  0x54   :  { %593 = vmatpush3.bf16.msra.mxu0 %v590_v17  ;;  %v646_v44 = vpack.c.bf16 %v223_v40, %v222_v39  ;;  %v610_v45 = vpack.c.bf16 %v121_v43, %v120_v42  ;;  %v123_v47 = vld [vmem:[#allocation7 + $0x78] sm:$0xff]  ;;  %v308_v50 = vld [vmem:[#allocation10] sm:$0xff]  ;;  %v309_v51 = vld [vmem:[#allocation10 + $0x8] sm:$0xff] }
  0x55   :  { %629 = vmatpush3.bf16.msra.mxu1 %v626_v8  ;;  %595 = vmatprep.subr.bf16.mxu0 %v594_v23  ;;  %v614_v48 = vpack.c.bf16 %v123_v47, %v122_v46  ;;  %v105_v49 = vld [vmem:[#allocation4 + $0x8] sm:$0xff]  ;;  %v650_v52 = vpack.c.bf16 %v309_v51, %v308_v50  ;;  %v310_v53 = vld [vmem:[#allocation10 + $0x10] sm:$0xff]  ;;  %v312_v56 = vld [vmem:[#allocation10 + $0x20] sm:$0xff] }
  0x56   :  { %631 = vmatprep.subr.bf16.mxu1 %v630_v20  ;;  %v311_v54 = vld [vmem:[#allocation10 + $0x18] sm:$0xff]  ;;  %v313_v57 = vld [vmem:[#allocation10 + $0x28] sm:$0xff]  ;;  %v314_v59 = vld [vmem:[#allocation10 + $0x30] sm:$0xff] }
  0x57   :  { %v654_v55 = vpack.c.bf16 %v311_v54, %v310_v53  ;;  %v658_v58 = vpack.c.bf16 %v313_v57, %v312_v56  ;;  %v315_v60 = vld [vmem:[#allocation10 + $0x38] sm:$0xff]  ;;  %v316_v62 = vld [vmem:[#allocation10 + $0x40] sm:$0xff]  ;;  %v317_v63 = vld [vmem:[#allocation10 + $0x48] sm:$0xff] }
  0x58   :  { %597 = vmatpush3.bf16.msra.mxu0 %v594_v23  ;;  %v662_v61 = vpack.c.bf16 %v315_v60, %v314_v59  ;;  %v666_v0 = vpack.c.bf16 %v317_v63, %v316_v62  ;;  %v318_v1 = vld [vmem:[#allocation10 + $0x50] sm:$0xff]  ;;  %v319_v2 = vld [vmem:[#allocation10 + $0x58] sm:$0xff]  ;;  %v320_v4 = vld [vmem:[#allocation10 + $0x60] sm:$0xff] }
  0x59   :  { %633 = vmatpush3.bf16.msra.mxu1 %v630_v20  ;;  %599 = vmatprep.subr.bf16.mxu0 %v598_v29  ;;  %v670_v3 = vpack.c.bf16 %v319_v2, %v318_v1  ;;  %v321_v5 = vld [vmem:[#allocation10 + $0x68] sm:$0xff]  ;;  %v322_v7 = vld [vmem:[#allocation10 + $0x70] sm:$0xff]  ;;  %v323_v8 = vld [vmem:[#allocation10 + $0x78] sm:$0xff] }
  0x5a   :  { %635 = vmatprep.subr.bf16.mxu1 %v634_v26  ;;  %v674_v6 = vpack.c.bf16 %v321_v5, %v320_v4  ;;  %v678_v9 = vpack.c.bf16 %v323_v8, %v322_v7  ;;  %v426_v12 = vld [vmem:[%s942_s2] ss:$0 sm:$0xff] }
  0x5c   :  { %601 = vmatpush3.bf16.msra.mxu0 %v598_v29 }
  0x5d   :  { %637 = vmatpush3.bf16.msra.mxu1 %v634_v26  ;;  %603 = vmatprep.subr.bf16.mxu0 %v602_v35 }
  0x5e   :  { %639 = vmatprep.subr.bf16.mxu1 %v638_v32 }
  0x60   :  { %605 = vmatpush3.bf16.msra.mxu0 %v602_v35 }
  0x61   :  { %641 = vmatpush3.bf16.msra.mxu1 %v638_v32  ;;  %607 = vmatprep.subr.bf16.mxu0 %v606_v41 }
  0x62   :  { %643 = vmatprep.subr.bf16.mxu1 %v642_v38 }
  0x64   :  { %609 = vmatpush3.bf16.msra.mxu0 %v606_v41 }
  0x65   :  { %645 = vmatpush3.bf16.msra.mxu1 %v642_v38  ;;  %611 = vmatprep.subr.bf16.mxu0 %v610_v45 }
  0x66   :  { %647 = vmatprep.subr.bf16.mxu1 %v646_v44 }
  0x68   :  { %613 = vmatpush3.bf16.msra.mxu0 %v610_v45 }
  0x69   :  { %649 = vmatpush3.bf16.msra.mxu1 %v646_v44  ;;  %615 = vmatprep.subr.bf16.mxu0 %v614_v48 }
  0x6c   :  { %549 = vmatmul.mubr.f32.vlgmr.msra.gmra.mrb[0].mxu1 %v105_v49  ;;  %617 = vmatpush3.bf16.msra.mxu0 %v614_v48 }
  0x6d   :  { %651 = vmatprep.subr.bf16.mxu0 %v650_v52 }
  0x6f   :  { %514 = vmatmul.mubr.f32.vlgmr.msra.gmra.mrb[0].mxu0 %v105_v49 }
  0x70   :  { %653 = vmatpush3.bf16.msra.mxu0 %v650_v52 }
  0x71   :  { %655 = vmatprep.subr.bf16.mxu0 %v654_v55 }
  0x74   :  { %657 = vmatpush3.bf16.msra.mxu0 %v654_v55 }
  0x75   :  { %659 = vmatprep.subr.bf16.mxu0 %v658_v58 }
  0x78   :  { %661 = vmatpush3.bf16.msra.mxu0 %v658_v58 }
  0x79   :  { %663 = vmatprep.subr.bf16.mxu0 %v662_v61 }
  0x7c   :  { %665 = vmatpush3.bf16.msra.mxu0 %v662_v61 }
  0x7d   :  { %667 = vmatprep.subr.bf16.mxu0 %v666_v0 }
  0x80   :  { %669 = vmatpush3.bf16.msra.mxu0 %v666_v0 }
  0x81   :  { %671 = vmatprep.subr.bf16.mxu0 %v670_v3 }
  0x84   :  { %673 = vmatpush3.bf16.msra.mxu0 %v670_v3 }
  0x85   :  { %675 = vmatprep.subr.bf16.mxu0 %v674_v6 }
  0x88   :  { %677 = vmatpush3.bf16.msra.mxu0 %v674_v6 }
  0x89   :  { %679 = vmatprep.subr.bf16.mxu0 %v678_v9 }
  0x8c   :  { %681 = vmatpush3.bf16.msra.mxu0 %v678_v9 }
 0x13f   :  { %v550_v10 = vpop.f32.mrb[0].mxu1 }
 0x140   :  { %v290_v11 = vpop.f32.mrb[1].mxu1 }
 0x141   :  { %583 = vmatprep.mubr.f32.mxu0 %v290_v11 }
 0x142   :  { %584 = vmatmul.mubr.f32.vlgmr.msra.gmra.mrb[0].mxu0 %v550_v10 }
 0x215   :  { %v585_v13 = vpop.f32.mrb[0].mxu0 }
 0x216   :  { %v682_v14 = vadd.f32 %v585_v13, %v426_v12  ;;  %v390_v15 = vpop.f32.mrb[1].mxu0 }
 0x217   :  { %v683_v16 = vadd.f32 %v426_v12, %v390_v15 }
 0x218   :  { %404 = vst [vmem:[#allocation12 + $0x8] sm:$0xff] %v682_v14 }
 0x219   :  { %403 = vst [vmem:[#allocation12] sm:$0xff] %v683_v16 }
 0x21a   :  { %792 = shalt.err (!%p789_p8)
}
 0x21b   :  { %s793_s2 = scalar_lea.hbm %s945_s5, 256 }
 0x21c   :  { %p794_p9 = scmp.ne.s32.totalorder %s945_s5, %s793_s2  ;;  %p797_p10 = scmp.lt.u32.totalorder %s793_s2, %s945_s5 }
 0x21e   :  { %p799_p11 = pnand %p797_p10, %p794_p9 }
 0x220   :  { %802 = shalt.err (!%p799_p11)
}
 0x221   :  { %416 = dma.vmem_to_hbm [thread:$0]  %s411_s18, 256, %s945_s5, [#allocation6], %s813_s30, %s813_s30, %s814_s6  }
 0x222   :  { %809 = dma.done.wait [#allocation6], 256  }
 0x223   :  { %810 = vsyncadd [#allocation6], 4294967040 }
 0x224   :  { %420 = vsyncpa [#allocation5], 1 }
 0x225   :  { %421 = vsyncpa [#allocation8], 1 }
 0x226   :  { %422 = vsyncpa [#allocation11], 1 }
 0x227   :  { %423 = vsyncpa [#allocation6], 1 }

</bundles_post_ra>
